<compile_context>
chip_gen: v7x
topology: tpu7x:2x2x1
jax: 0.10.0
libtpu: 0.0.40
codegen_flags: <defaults>
</compile_context>

<pallas_src>
import functools

import jax
import jax.numpy as jnp
from jax.experimental import pallas as pl
from jax.experimental.pallas import tpu as pltpu


def _pinn_kernel(x_ref, wq_ref, vp_ref, o_ref, *, use_bf16):
    x = x_ref[...]                                         # (1, T) times t, lane-dense

    # ---- resident packed parameters ----
    coeff = vp_ref[:, 0:1]                                 # (H, 1) [sin; cos; 0...]
    phase = vp_ref[:, 1:2]                                 # (H, 1) [0; pi/2; 0...]
    b1 = vp_ref[:, 2:3]                                    # (H, 1)
    b2 = vp_ref[:, 3:4]
    b3 = vp_ref[:, 4:5]
    b4 = vp_ref[0:2, 5:6]                                  # (2, 1)
    y0 = vp_ref[0:2, 6:7]                                  # (2, 1)

    # ---- Fourier features, fused sin/cos, no VMEM scratch ----
    # rows 0:F   -> sin(sin_coeff * t)
    # rows F:2F  -> sin(cos_coeff * t + pi/2) == cos(cos_coeff * t)
    # rows 2F:H  -> sin(0) == 0   (lets layer 1 use the full (H, H) weight)
    feat = jnp.sin(coeff * x + phase)                      # (H, T)

    mm_dtype = jnp.bfloat16 if use_bf16 else jnp.float32

    def dot(w, a):
        return jnp.dot(w.astype(mm_dtype), a.astype(mm_dtype),
                       preferred_element_type=jnp.float32)

    # ---- MLP, batch on the lane axis (tanh / biases stay f32) ----
    h = jnp.tanh(dot(wq_ref[0], feat) + b1)                # (H, T)
    h = jnp.tanh(dot(wq_ref[1], h) + b2)
    h = jnp.tanh(dot(wq_ref[2], h) + b3)
    out = dot(wq_ref[3][0:2, :], h) + b4                   # (2, T)

    # scaled = y0 + tanh(t) * [1, 1] * out   (the [1, 1] factor is identity)
    o_ref[...] = y0 + jnp.tanh(x) * out                    # lane-dense (2, T) store


def _pack_params(p, *, hidden_units, num_features, weight_dtype=jnp.float32):
    """Pack the 11 small parameter tensors into two VMEM-resident buffers."""
    h, f = hidden_units, num_features
    assert 2 * f <= h, "packing requires 2*num_features <= hidden_units"
    assert h >= 2, "packing requires hidden_units >= 2"
    assert p["w1"].shape == (h, 2 * f) and p["w4"].shape == (2, h)

    # Weight stack: four (H, H) slots (w1 zero-padded in columns, w4 in rows).
    wq = jnp.zeros((4, h, h), weight_dtype)
    wq = wq.at[0, :, :2 * f].set(p["w1"].astype(weight_dtype))
    wq = wq.at[1].set(p["w2"].astype(weight_dtype))
    wq = wq.at[2].set(p["w3"].astype(weight_dtype))
    wq = wq.at[3, :2, :].set(p["w4"].astype(weight_dtype))

    # Column-vector parameters: one (H, 8) slab.
    vp = jnp.zeros((h, 8), jnp.float32)
    vp = vp.at[:f, 0].set(p["sin_coeff"][:, 0])            # fused coeff column
    vp = vp.at[f:2 * f, 0].set(p["cos_coeff"][:, 0])
    vp = vp.at[f:2 * f, 1].set(jnp.pi / 2)                 # phase column
    vp = vp.at[:, 2].set(p["b1"])
    vp = vp.at[:, 3].set(p["b2"])
    vp = vp.at[:, 4].set(p["b3"])
    vp = vp.at[:2, 5].set(p["b4"])
    vp = vp.at[:2, 6].set(p["y0"])
    return wq, vp


def _round_up(a, b):
    return ((a + b - 1) // b) * b


def _choose_tiling(n, max_block):
    """Pick (block_n, n_pad): lane-multiple tiles, >=2 tiles when possible."""
    lanes = _round_up(max(n, 1), 128)
    if lanes <= 128:
        return 128, 128                                    # tiny batch: one 128-lane tile
    # Aim for >= 2 grid tiles so ("parallel",) shards across both v7x TCs,
    # capped at max_block lanes per tile to amortize per-grid-step overhead.
    block = min(max_block, _round_up((lanes + 1) // 2, 128))
    n_pad = _round_up(lanes, block)
    return block, n_pad


def pinn_forward(x, params, *, max_block=2048, use_bf16=False, batch_major=True):
    """x: (N, 1) f32 times.

    Returns (N, 2) f32 (same as PinnModel.forward) when batch_major=True,
    or the kernel-native lane-dense (2, N) slab when batch_major=False
    (avoids a strided HBM transpose for large N).
    """
    f = params["sin_coeff"].shape[0]
    h = params["b1"].shape[0]
    n = x.shape[0]

    block_n, n_pad = _choose_tiling(n, max_block)

    # Batch goes on the 128-lane axis, padded up to a multiple of the tile.
    x_t = jnp.zeros((1, n_pad), jnp.float32).at[0, :n].set(
        x[:, 0].astype(jnp.float32))

    wq, vp = _pack_params(params, hidden_units=h, num_features=f)
    kernel = functools.partial(_pinn_kernel, use_bf16=use_bf16)

    out_t = pl.pallas_call(
        kernel,
        out_shape=jax.ShapeDtypeStruct((2, n_pad), jnp.float32),
        grid=(n_pad // block_n,),
        in_specs=[
            pl.BlockSpec((1, block_n), lambda i: (0, i)),   # x tile (pipelined)
            pl.BlockSpec((4, h, h), lambda i: (0, 0, 0)),   # packed weights, resident
            pl.BlockSpec((h, 8), lambda i: (0, 0)),         # packed vectors, resident
        ],
        out_specs=pl.BlockSpec((2, block_n), lambda i: (0, i)),
        compiler_params=pltpu.CompilerParams(
            dimension_semantics=("parallel",),      # shard batch tiles across TCs (v7x)
            vmem_limit_bytes=32 * 1024 * 1024,      # ample even at block_n=2048
        ),
    )(x_t, wq, vp)

    if batch_major:
        # PyTorch API shape; for large N prefer batch_major=False (or keep this
        # under the consumer's jit so layout assignment can elide the copy).
        return out_t[:, :n].T                               # (N, 2)
    return out_t[:, :n]                                     # (2, N)


def make_params(key, num_features, hidden_units, std, y0):
    ks = jax.random.split(key, 10)
    f, h = num_features, hidden_units
    # Fourier coefficients ~ N(0, std), PyTorch shape (F, 1).
    sin_coeff = std * jax.random.normal(ks[0], (f, 1), jnp.float32)
    cos_coeff = std * jax.random.normal(ks[1], (f, 1), jnp.float32)

    # nn.Linear init: weight (out, in), bias (out,), U(-1/sqrt(fan_in), +).
    def linear(kw, kb, fan_in, fan_out):
        bound = 1.0 / jnp.sqrt(jnp.float32(fan_in))
        w = jax.random.uniform(kw, (fan_out, fan_in), jnp.float32, -bound, bound)
        b = jax.random.uniform(kb, (fan_out,), jnp.float32, -bound, bound)
        return w, b

    w1, b1 = linear(ks[2], ks[3], 2 * f, h)
    w2, b2 = linear(ks[4], ks[5], h, h)
    w3, b3 = linear(ks[6], ks[7], h, h)
    w4, b4 = linear(ks[8], ks[9], h, 2)

    return {
        "sin_coeff": sin_coeff, "cos_coeff": cos_coeff,
        "w1": w1, "b1": b1,
        "w2": w2, "b2": b2,
        "w3": w3, "b3": b3,
        "w4": w4, "b4": b4,
        "y0": jnp.asarray(y0, jnp.float32),
    }


def pinn_reference(x, p):
    """Pure-JAX mirror of PinnModel.forward (PyTorch semantics)."""
    sin_feats = jnp.sin(x @ p["sin_coeff"].T)
    cos_feats = jnp.cos(x @ p["cos_coeff"].T)
    feat = jnp.concatenate([sin_feats, cos_feats], axis=1)
    h = jnp.tanh(feat @ p["w1"].T + p["b1"])
    h = jnp.tanh(h @ p["w2"].T + p["b2"])
    h = jnp.tanh(h @ p["w3"].T + p["b3"])
    out = h @ p["w4"].T + p["b4"]
    return p["y0"] + jnp.tanh(x) * jnp.array([1.0, 1.0], jnp.float32) * out


if __name__ == "__main__":
    key = jax.random.PRNGKey(0)
    k_param, k_x = jax.random.split(key)

    num_features = 4
    hidden_units = 32
    std = 1.0
    y0 = [0.1, 0.5]
    batch = 8

    params = make_params(k_param, num_features, hidden_units, std, y0)
    x = jax.random.uniform(k_x, (batch, 1), jnp.float32, 0.0, 10.0)  # times t

    out = pinn_forward(x, params)                    # f32 everywhere (safe on v5e)
    out = jax.block_until_ready(out)

    ref = pinn_reference(x, params)
    assert out.shape == (batch, 2), out.shape
    assert jnp.allclose(out, ref, atol=2e-5, rtol=1e-4), (out, ref)

    # Exercise the multi-tile ("parallel") path with a larger padded batch too.
    x_big = jax.random.uniform(jax.random.PRNGKey(1), (2048, 1), jnp.float32, 0.0, 10.0)
    out_big = jax.block_until_ready(pinn_forward(x_big, params, batch_major=False))
    ref_big = pinn_reference(x_big, params)
    assert out_big.shape == (2, 2048), out_big.shape
    assert jnp.allclose(out_big.T, ref_big, atol=2e-5, rtol=1e-4)

    print("KERNEL_OK")
</pallas_src>

<mosaic_0001>
module attributes {stable_mosaic.version = 11 : i64} {
  func.func @_pinn_kernel(%arg0: i32, %arg1: memref<1x128xf32, #tpu.memory_space<vmem>>, %arg2: memref<4x32x32xf32, #tpu.memory_space<vmem>>, %arg3: memref<32x8xf32, #tpu.memory_space<vmem>>, %arg4: memref<2x128xf32, #tpu.memory_space<vmem>>) attributes {dimension_semantics = [#tpu.dimension_semantics<parallel>], iteration_bounds = array<i64: 1>, scalar_prefetch = 0 : i64, scratch_operands = 0 : i64, tpu.core_type = #tpu.core_type<tc>, window_params = [{transform_indices = @transform_0, window_bounds = array<i64: 1, 128>}, {pipeline_mode = #tpu.pipeline_mode<synchronous>, transform_indices = @transform_1, window_bounds = array<i64: 4, 32, 32>}, {pipeline_mode = #tpu.pipeline_mode<synchronous>, transform_indices = @transform_2, window_bounds = array<i64: 32, 8>}, {transform_indices = @transform_3, window_bounds = array<i64: 2, 128>}]} {
    %c0 = arith.constant 0 : index
    %c0_0 = arith.constant 0 : index
    %0 = vector.load %arg1[%c0, %c0_0] : memref<1x128xf32, #tpu.memory_space<vmem>>, vector<1x128xf32>
    %c0_1 = arith.constant 0 : index
    %c0_2 = arith.constant 0 : index
    %1 = vector.load %arg3[%c0_1, %c0_2] : memref<32x8xf32, #tpu.memory_space<vmem>>, vector<32x1xf32>
    %c0_3 = arith.constant 0 : index
    %c1 = arith.constant 1 : index
    %2 = vector.load %arg3[%c0_3, %c1] : memref<32x8xf32, #tpu.memory_space<vmem>>, vector<32x1xf32>
    %c0_4 = arith.constant 0 : index
    %c2 = arith.constant 2 : index
    %3 = vector.load %arg3[%c0_4, %c2] : memref<32x8xf32, #tpu.memory_space<vmem>>, vector<32x1xf32>
    %c0_5 = arith.constant 0 : index
    %c3 = arith.constant 3 : index
    %4 = vector.load %arg3[%c0_5, %c3] : memref<32x8xf32, #tpu.memory_space<vmem>>, vector<32x1xf32>
    %c0_6 = arith.constant 0 : index
    %c4 = arith.constant 4 : index
    %5 = vector.load %arg3[%c0_6, %c4] : memref<32x8xf32, #tpu.memory_space<vmem>>, vector<32x1xf32>
    %c0_7 = arith.constant 0 : index
    %c5 = arith.constant 5 : index
    %6 = vector.load %arg3[%c0_7, %c5] : memref<32x8xf32, #tpu.memory_space<vmem>>, vector<2x1xf32>
    %c0_8 = arith.constant 0 : index
    %c6 = arith.constant 6 : index
    %7 = vector.load %arg3[%c0_8, %c6] : memref<32x8xf32, #tpu.memory_space<vmem>>, vector<2x1xf32>
    %8 = vector.broadcast %1 : vector<32x1xf32> to vector<32x128xf32>
    %9 = vector.broadcast %0 : vector<1x128xf32> to vector<32x128xf32>
    %10 = arith.mulf %8, %9 : vector<32x128xf32>
    %11 = vector.broadcast %2 : vector<32x1xf32> to vector<32x128xf32>
    %12 = arith.addf %10, %11 : vector<32x128xf32>
    %13 = math.sin %12 : vector<32x128xf32>
    %c0_9 = arith.constant 0 : index
    %c0_10 = arith.constant 0 : index
    %c0_11 = arith.constant 0 : index
    %14 = vector.load %arg2[%c0_9, %c0_10, %c0_11] : memref<4x32x32xf32, #tpu.memory_space<vmem>>, vector<1x32x32xf32>
    %15 = vector.shape_cast %14 : vector<1x32x32xf32> to vector<32x32xf32>
    %cst = arith.constant dense<0.000000e+00> : vector<32x128xf32>
    %16 = tpu.matmul %15, %13, %cst {dimension_numbers = #tpu.dot_dimension_numbers<[1], [0], [0], [1], [0, 0, 1, 1], [], []>} : vector<32x32xf32>, vector<32x128xf32>, vector<32x128xf32> -> vector<32x128xf32>
    %17 = vector.broadcast %3 : vector<32x1xf32> to vector<32x128xf32>
    %18 = arith.addf %16, %17 : vector<32x128xf32>
    %19 = math.tanh %18 : vector<32x128xf32>
    %c1_12 = arith.constant 1 : index
    %c0_13 = arith.constant 0 : index
    %c0_14 = arith.constant 0 : index
    %20 = vector.load %arg2[%c1_12, %c0_13, %c0_14] : memref<4x32x32xf32, #tpu.memory_space<vmem>>, vector<1x32x32xf32>
    %21 = vector.shape_cast %20 : vector<1x32x32xf32> to vector<32x32xf32>
    %cst_15 = arith.constant dense<0.000000e+00> : vector<32x128xf32>
    %22 = tpu.matmul %21, %19, %cst_15 {dimension_numbers = #tpu.dot_dimension_numbers<[1], [0], [0], [1], [0, 0, 1, 1], [], []>} : vector<32x32xf32>, vector<32x128xf32>, vector<32x128xf32> -> vector<32x128xf32>
    %23 = vector.broadcast %4 : vector<32x1xf32> to vector<32x128xf32>
    %24 = arith.addf %22, %23 : vector<32x128xf32>
    %25 = math.tanh %24 : vector<32x128xf32>
    %c2_16 = arith.constant 2 : index
    %c0_17 = arith.constant 0 : index
    %c0_18 = arith.constant 0 : index
    %26 = vector.load %arg2[%c2_16, %c0_17, %c0_18] : memref<4x32x32xf32, #tpu.memory_space<vmem>>, vector<1x32x32xf32>
    %27 = vector.shape_cast %26 : vector<1x32x32xf32> to vector<32x32xf32>
    %cst_19 = arith.constant dense<0.000000e+00> : vector<32x128xf32>
    %28 = tpu.matmul %27, %25, %cst_19 {dimension_numbers = #tpu.dot_dimension_numbers<[1], [0], [0], [1], [0, 0, 1, 1], [], []>} : vector<32x32xf32>, vector<32x128xf32>, vector<32x128xf32> -> vector<32x128xf32>
    %29 = vector.broadcast %5 : vector<32x1xf32> to vector<32x128xf32>
    %30 = arith.addf %28, %29 : vector<32x128xf32>
    %31 = math.tanh %30 : vector<32x128xf32>
    %c3_20 = arith.constant 3 : index
    %c0_21 = arith.constant 0 : index
    %c0_22 = arith.constant 0 : index
    %32 = vector.load %arg2[%c3_20, %c0_21, %c0_22] : memref<4x32x32xf32, #tpu.memory_space<vmem>>, vector<1x32x32xf32>
    %33 = vector.shape_cast %32 : vector<1x32x32xf32> to vector<32x32xf32>
    %34 = vector.extract_strided_slice %33 {offsets = [0, 0], sizes = [2, 32], strides = [1, 1]} : vector<32x32xf32> to vector<2x32xf32>
    %cst_23 = arith.constant dense<0.000000e+00> : vector<2x128xf32>
    %35 = tpu.matmul %34, %31, %cst_23 {dimension_numbers = #tpu.dot_dimension_numbers<[1], [0], [0], [1], [0, 0, 1, 1], [], []>} : vector<2x32xf32>, vector<32x128xf32>, vector<2x128xf32> -> vector<2x128xf32>
    %36 = vector.broadcast %6 : vector<2x1xf32> to vector<2x128xf32>
    %37 = arith.addf %35, %36 : vector<2x128xf32>
    %38 = math.tanh %0 : vector<1x128xf32>
    %39 = vector.broadcast %38 : vector<1x128xf32> to vector<2x128xf32>
    %40 = arith.mulf %39, %37 : vector<2x128xf32>
    %41 = vector.broadcast %7 : vector<2x1xf32> to vector<2x128xf32>
    %42 = arith.addf %41, %40 : vector<2x128xf32>
    %c0_24 = arith.constant 0 : index
    %c0_25 = arith.constant 0 : index
    %43 = vector.load %arg4[%c0_24, %c0_25] : memref<2x128xf32, #tpu.memory_space<vmem>>, vector<2x128xf32>
    tpu.vector_store %arg4[%c0_24, %c0_25], %42 {strides = array<i32>} : memref<2x128xf32, #tpu.memory_space<vmem>>, vector<2x128xf32>,
    return
  }
  func.func @transform_0(%arg0: i32) -> (i32, i32) {
    %c0_i32 = arith.constant 0 : i32
    %c0_i32_0 = arith.constant 0 : i32
    return %c0_i32, %arg0 : i32, i32
  }
  func.func @transform_1(%arg0: i32) -> (i32, i32, i32) {
    %c0_i32 = arith.constant 0 : i32
    %c0_i32_0 = arith.constant 0 : i32
    %c0_i32_1 = arith.constant 0 : i32
    %c0_i32_2 = arith.constant 0 : i32
    return %c0_i32, %c0_i32_0, %c0_i32_1 : i32, i32, i32
  }
  func.func @transform_2(%arg0: i32) -> (i32, i32) {
    %c0_i32 = arith.constant 0 : i32
    %c0_i32_0 = arith.constant 0 : i32
    %c0_i32_1 = arith.constant 0 : i32
    return %c0_i32, %c0_i32_0 : i32, i32
  }
  func.func @transform_3(%arg0: i32) -> (i32, i32) {
    %c0_i32 = arith.constant 0 : i32
    %c0_i32_0 = arith.constant 0 : i32
    return %c0_i32, %arg0 : i32, i32
  }
}

</mosaic_0001>

<bundles_post_ra>
// kernel: tpu_custom_call.1
= control target key start
LH: loop header
LB: loop body
LE: loop exit
PB: predicated region body
PF: predicated region fallthrough
CT: control target
= control target key end

     0   :  { %8 = vsyncpa [#allocation3], 0  ;;  %s1727_s0 = inlined_call_operand.vmem [shape: f32[1,128], index: 0, kind: input, shape index: {}]   ;;  %s1728_s1 = inlined_call_operand.hbm [shape: f32[4,32,32], index: 1, kind: input, shape index: {}]   ;;  %s1729_s2 = inlined_call_operand.vmem [shape: f32[32,8], index: 2, kind: input, shape index: {}]   ;;  %s1730_s3 = inlined_call_operand.hbm [shape: f32[2,128], index: 3, kind: output, shape index: {}]  }
   0x1   :  { %9 = vsyncpa [#allocation4], 0  ;;  %s1259_s12 = smov [#allocation2]   ;;  %s1211_s16 = scalar_lea.hbm %s1728_s1, 2048 }
   0x2   :  { %s17_s13 = sshll.u32 %s1259_s12, 4  ;;  %p1212_p0 = scmp.ne.s32.totalorder %s1728_s1, %s1211_s16  ;;  %s18_s13 = int_to_ptr.vmem [resolvable:$true] %s17_s13 }
   0x3   :  { %p1215_p1 = scmp.lt.u32.totalorder %s1211_s16, %s1728_s1 }
   0x5   :  { %p1217_p2 = pnand %p1215_p1, %p1212_p0 }
   0x7   :  { %1220 = shalt.err (!%p1217_p2)
}
   0x8   :  { %s1221_s21 = scalar_lea.vmem %s18_s13, 2048  ;;  %p1226_p4 = scmp.lt.s32.totalorder %s18_s13, %s18_s13 }
   0x9   :  { %p1222_p3 = scmp.ne.s32.totalorder %s18_s13, %s1221_s21  ;;  %p1227_p5 = scmp.lt.s32.totalorder %s1221_s21, %s1221_s21 }
   0xb   :  { %p1228_p6 = por %p1227_p5, %p1226_p4 }
   0xd   :  { %p1229_p7 = pnand %p1228_p6, %p1222_p3 }
   0xf   :  { %1232 = shalt.err (!%p1229_p7)
}
  0x10   :  { %s1260_s22 = smov 128   ;;  %s1261_s23 = smov 8  }
  0x11   :  { %23 = dma.hbm_to_vmem [thread:$0]  %s1728_s1, 2048, %s18_s13, [#allocation3], %s1260_s22, %s1260_s22, %s1261_s23  }
  0x12   :  { %1255 = dma.done.wait [#allocation3], 2048  }
  0x13   :  { %1256 = vsyncadd [#allocation3], 4294965248  ;;  %v1262_v0 = vmov 1   ;;  %v1263_v1 = vmov 0   ;;  %v1314_v2 = vld [vmem:[%s1729_s2] sm:$0xff]  ;;  %v1321_v3 = vld [vmem:[%s1729_s2 + $0x8] sm:$0xff]  ;;  %v56_v6 = vlaneseq }
  0x14   :  { %1154 = vset.pattern.permute.xlu1 %v1262_v0  ;;  %1153 = vset.pattern.permute.xlu0 %v1263_v1  ;;  %v1328_v4 = vld [vmem:[%s1729_s2 + $0x10] sm:$0xff]  ;;  %v1333_v5 = vld [vmem:[%s1729_s2 + $0x18] sm:$0xff]  ;;  %v1210_v9 = vld [vmem:[%s1727_s0] ss:$0 sm:$0xff]  ;;  %vm521_vm1 = vcmask 261120   ;;  %s1278_s11 = smov [#allocation5]  }
  0x15   :  { %66 = vperm.xlu1 %1154, %v1314_v2   ;;  %37 = vperm.xlu0 %1153, %v1314_v2   ;;  %v1339_v7 = vshrl.u32 %v56_v6, 7  ;;  %v501_v33 = vld [vmem:[#allocation2] sm:$0xff]  ;;  %v1264_v43 = vmov 920167782   ;;  %v1265_v48 = vmov 1326507024  }
  0x16   :  { %1042 = vmatprep.mubr.msk.f32.mxu0 %vm521_vm1, %v501_v33  ;;  %v1735_v54 = vmov 2102212464   ;;  %s967_s12 = sshll.u32 %s1278_s11, 4  ;;  %s968_s12 = int_to_ptr.vmem [resolvable:$true] %s967_s12 }
  0x17   :  { %s1233_s13 = scalar_lea.vmem %s968_s12, 32  ;;  %p1238_p9 = scmp.lt.s32.totalorder %s968_s12, %s968_s12 }
  0x18   :  { %p1234_p8 = scmp.ne.s32.totalorder %s968_s12, %s1233_s13  ;;  %p1239_p10 = scmp.lt.s32.totalorder %s1233_s13, %s1233_s13 }
  0x19   :  { %70 = vperm.xlu1 %1154, %v1321_v3   ;;  %42 = vperm.xlu0 %1153, %v1321_v3  }
  0x1a   :  { %p1240_p11 = por %p1239_p10, %p1238_p9 }
  0x1c   :  { %p1241_p12 = pnand %p1240_p11, %p1234_p8 }
  0x1d   :  { %1155 = vset.pattern.permute.xlu1 %v1263_v1  ;;  %47 = vperm.xlu0 %1153, %v1328_v4  }
  0x1e   :  { %52 = vperm.xlu1 %1155, %v1333_v5  }
  0x21   :  { %1156 = vset.pattern.permute.xlu0 %v1262_v0 }
  0x22   :  { %1157 = vset.pattern.permute.xlu1 %v1262_v0  ;;  %74 = vperm.xlu0 %1156, %v1328_v4  }
  0x23   :  { %78 = vperm.xlu1 %1157, %v1333_v5  }
  0x94   :  { %v67_v10 = vpop.permute.xlu1 %66  ;;  %v38_v11 = vpop.permute.xlu0 %37 }
  0x95   :  { %v61_v12 = vmul.f32 %v1210_v9, %v38_v11 }
  0x97   :  { %v1345_v13 = vadd.f32 %v67_v10, %v61_v12 }
  0x98   :  { %v71_v14 = vpop.permute.xlu1 %70  ;;  %v43_v15 = vpop.permute.xlu0 %42 }
  0x99   :  { %v88_v16 = vand.u32 2139095040, %v1345_v13  ;;  %v62_v17 = vmul.f32 %v1210_v9, %v43_v15  ;;  %v1732_v26 = vand.u32 2147483647, %v1345_v13 }
  0x9b   :  { %v89_v18 = vshrl.u32 %v88_v16, 23  ;;  %v1348_v19 = vadd.f32 %v71_v14, %v62_v17  ;;  %v92_v37 = vand.u32 8388607, %v1732_v26 }
  0x9c   :  { %v48_v20 = vpop.permute.xlu0 %47 }
  0x9d   :  { %v976_v21 = vadd.s32 4294967169, %v89_v18  ;;  %v192_v22 = vand.u32 2139095040, %v1348_v19  ;;  %v53_v23 = vpop.permute.xlu1 %52  ;;  %v63_v27 = vmul.f32 %v1210_v9, %v48_v20  ;;  %v93_v46 = vor.u32 8388608, %v92_v37 }
  0x9e   :  { %v64_v36 = vmul.f32 %v1210_v9, %v53_v23  ;;  %v1731_v47 = vand.u32 2147483647, %v1348_v19  ;;  %v1267_v9 = vmov 2475754826   ;;  %v1268_v20 = vmov 683565275  }
  0x9f   :  { %v95_v24 = vadd.s32 1, %v976_v21  ;;  %v193_v25 = vshrl.u32 %v192_v22, 23  ;;  %v1384_v60 = vshll.u32 %v93_v46, 8 }
  0xa0   :  { %v1388_v61 = vand.u32 8388607, %v1731_v47 }
  0xa1   :  { %vm96_vm0 = vcmp.gt.s32.totalorder %v95_v24, 0  ;;  %v980_v28 = vadd.s32 4294967169, %v193_v25  ;;  %v75_v29 = vpop.permute.xlu0 %74 }
  0xa2   :  { %v97_v30 = vsel %vm96_vm0, %v95_v24, 0  ;;  %v1352_v31 = vadd.f32 %v75_v29, %v63_v27  ;;  %v79_v32 = vpop.permute.xlu1 %78 }
  0xa3   :  { %v1354_v34 = vand.u32 31, %v97_v30  ;;  %v199_v35 = vadd.s32 1, %v980_v28  ;;  %v1364_v41 = vadd.f32 %v79_v32, %v64_v36  ;;  %v1375_v53 = vshrl.u32 %v97_v30, 5 }
  0xa4   :  { %v1734_v38 = vand.u32 2147483647, %v1352_v31  ;;  %v296_v39 = vand.u32 2139095040, %v1352_v31 }
  0xa5   :  { %v1362_v40 = vsub.s32 32, %v1354_v34  ;;  %vm200_vm2 = vcmp.gt.s32.totalorder %v199_v35, 0  ;;  %v111_v55 = vshll.u32 %v1735_v54, %v1354_v34  ;;  %v1733_v56 = vand.u32 2147483647, %v1364_v41 }
  0xa6   :  { %v297_v42 = vshrl.u32 %v296_v39, 23  ;;  %v201_v45 = vsel %vm200_vm2, %v199_v35, 0  ;;  %v300_v52 = vand.u32 8388607, %v1734_v38  ;;  %v114_v57 = vshll.u32 %v1264_v43, %v1354_v34 }
  0xa7   :  { %v112_v44 = vshrl.u32 %v1264_v43, %v1362_v40  ;;  %v115_v49 = vshrl.u32 %v1265_v48, %v1362_v40  ;;  %v1371_v50 = vand.u32 31, %v201_v45  ;;  %v400_v1 = vand.u32 2139095040, %v1364_v41 }
  0xa8   :  { %v984_v51 = vadd.s32 4294967169, %v297_v42  ;;  %v301_v0 = vor.u32 8388608, %v300_v52  ;;  %vm120_vm3 = vcmp.lt.s32.totalorder %v1375_v53, 4  ;;  %v404_v6 = vand.u32 8388607, %v1733_v56 }
  0xa9   :  { %v1382_v58 = vor.u32 %v112_v44, %v111_v55  ;;  %v116_v62 = vor.u32 %v115_v49, %v114_v57  ;;  %v1391_v63 = vsub.s32 32, %v1371_v50  ;;  %v103_v10 = vshrl.u32 %v1267_v9, %v1362_v40 }
  0xaa   :  { %v303_v59 = vadd.s32 1, %v984_v51  ;;  %v1399_v11 = vshrl.u32 %v201_v45, 5  ;;  %v1403_v12 = vshll.u32 %v1735_v54, %v1371_v50  ;;  %v401_v15 = vshrl.u32 %v400_v1, 23 }
  0xab   :  { %v1408_v16 = vsel %vm120_vm3, %v1382_v58, 920167782  ;;  %v1412_v17 = vshll.u32 %v1264_v43, %v1371_v50  ;;  %v102_v21 = vshll.u32 %v1268_v20, %v1354_v34  ;;  %v1418_v22 = vsel %vm120_vm3, %v116_v62, 1326507024 }
  0xac   :  { %vm304_vm4 = vcmp.gt.s32.totalorder %v303_v59, 0  ;;  %v1422_v23 = vshrl.u32 %v1264_v43, %v1391_v63  ;;  %v1424_v25 = vshll.u32 %v301_v0, 8  ;;  %v988_v28 = vadd.s32 4294967169, %v401_v15 }
  0xad   :  { %v305_v14 = vsel %vm304_vm4, %v303_v59, 0  ;;  %v405_v29 = vor.u32 8388608, %v404_v6  ;;  %v1426_v30 = vor.u32 %v103_v10, %v102_v21  ;;  %v1269_v35 = vmov 2131351028  }
  0xae   :  { %v307_v18 = vand.u32 31, %v305_v14  ;;  %v306_v24 = vshrl.u32 %v305_v14, 5  ;;  %v407_v59 = vadd.s32 1, %v988_v28  ;;  %vm117_vm15 = vcmp.lt.s32.totalorder %v1375_v53, 1 }
  0xaf   :  { %vm119_vm0 = vcmp.lt.s32.totalorder %v1375_v53, 3  ;;  %vm118_vm2 = vcmp.lt.s32.totalorder %v1375_v53, 2  ;;  %vm224_vm4 = vcmp.lt.s32.totalorder %v1399_v11, 4  ;;  %v212_v53 = vshll.u32 %v1269_v35, %v1371_v50 }
  0xb0   :  { %v308_v27 = vsub.s32 32, %v307_v18  ;;  %v310_v32 = vshll.u32 %v1268_v20, %v307_v18  ;;  %v313_v33 = vshll.u32 %v1267_v9, %v307_v18  ;;  %v316_v36 = vshll.u32 %v1269_v35, %v307_v18 }
  0xb1   :  { %v319_v37 = vshll.u32 %v1735_v54, %v307_v18  ;;  %v322_v45 = vshll.u32 %v1264_v43, %v307_v18  ;;  %vm325_vm5 = vcmp.lt.s32.totalorder %v306_v24, 1  ;;  %vm327_vm6 = vcmp.lt.s32.totalorder %v306_v24, 3 }
  0xb2   :  { %v311_v39 = vshrl.u32 %v1267_v9, %v308_v27  ;;  %v314_v42 = vshrl.u32 %v1269_v35, %v308_v27  ;;  %v317_v44 = vshrl.u32 %v1735_v54, %v308_v27  ;;  %v309_v46 = vshrl.u32 %v1268_v20, %v308_v27 }
  0xb3   :  { %v320_v49 = vshrl.u32 %v1264_v43, %v308_v27  ;;  %v323_v51 = vshrl.u32 %v1265_v48, %v308_v27  ;;  %vm328_vm7 = vcmp.lt.s32.totalorder %v306_v24, 4  ;;  %vm408_vm8 = vcmp.gt.s32.totalorder %v407_v59, 0 }
  0xb4   :  { %v312_v52 = vor.u32 %v311_v39, %v310_v32  ;;  %v315_v55 = vor.u32 %v314_v42, %v313_v33  ;;  %v318_v57 = vor.u32 %v317_v44, %v316_v36  ;;  %vm326_vm9 = vcmp.lt.s32.totalorder %v306_v24, 2 }
  0xb5   :  { %v321_v62 = vor.u32 %v320_v49, %v319_v37  ;;  %v324_v0 = vor.u32 %v323_v51, %v322_v45  ;;  %v409_v47 = vsel %vm408_vm8, %v407_v59, 0  ;;  %v105_v24 = vshll.u32 %v1267_v9, %v1354_v34 }
  0xb6   :  { %v329_v1 = vsel %vm325_vm5, %v309_v46, %v312_v52  ;;  %v330_v6 = vsel %vm328_vm7, %v318_v57, 2102212464  ;;  %v333_v10 = vsel %vm325_vm5, %v312_v52, %v315_v55  ;;  %v337_v14 = vsel %vm325_vm5, %v315_v55, %v318_v57 }
  0xb7   :  { %v331_v15 = vsel %vm327_vm6, %v315_v55, %v330_v6  ;;  %v334_v18 = vsel %vm328_vm7, %v321_v62, 920167782  ;;  %v338_v21 = vsel %vm328_vm7, %v324_v0, 1326507024  ;;  %v410_v28 = vshrl.u32 %v409_v47, 5 }
  0xb8   :  { %v335_v8 = vsel %vm327_vm6, %v318_v57, %v334_v18  ;;  %v339_v27 = vsel %vm327_vm6, %v321_v62, %v338_v21  ;;  %v332_v32 = vsel %vm326_vm9, %v329_v1, %v331_v15  ;;  %v411_v45 = vand.u32 31, %v409_v47 }
  0xb9   :  { %v336_v33 = vsel %vm326_vm9, %v333_v10, %v335_v8  ;;  %v340_v36 = vsel %vm326_vm9, %v337_v14, %v339_v27  ;;  %v1448_v46 = vshll.u32 %v405_v29, 8  ;;  %v106_v8 = vshrl.u32 %v1269_v35, %v1362_v40 }
  0xba   :  { %v1440_v37 = vmul.u32.u64.low %v1424_v25, %v340_v36  ;;  %v1441_v39 = vmul.u32.u64.high %v1424_v25, %v340_v36, %v1440_v37  ;;  %v1444_v42 = vmul.u32.u64.low %v1424_v25, %v336_v33  ;;  %v1445_v44 = vmul.u32.u64.high %v1424_v25, %v336_v33, %v1444_v42 }
  0xbb   :  { %v348_v49 = vmul.u32 %v1424_v25, %v332_v32  ;;  %vm429_vm10 = vcmp.lt.s32.totalorder %v410_v28, 1  ;;  %vm431_vm11 = vcmp.lt.s32.totalorder %v410_v28, 3  ;;  %v108_v51 = vshll.u32 %v1269_v35, %v1354_v34 }
  0xbc   :  { %v412_v52 = vsub.s32 32, %v411_v45  ;;  %v414_v55 = vshll.u32 %v1268_v20, %v411_v45  ;;  %v417_v47 = vshll.u32 %v1267_v9, %v411_v45  ;;  %vm430_vm12 = vcmp.lt.s32.totalorder %v410_v28, 2 }
  0xbd   :  { %v109_v29 = vshrl.u32 %v1735_v54, %v1362_v40  ;;  %vm350_vm13 = vc.u32 %v1441_v39, %v1444_v42  ;;  %v351_v57 = vadd.s32 1, %v1445_v44  ;;  %v420_v25 = vshll.u32 %v1269_v35, %v411_v45 }
  0xbe   :  { %v423_v59 = vshll.u32 %v1735_v54, %v411_v45  ;;  %v413_v34 = vshrl.u32 %v1268_v20, %v412_v52  ;;  %v415_v62 = vshrl.u32 %v1267_v9, %v412_v52  ;;  %v418_v0 = vshrl.u32 %v1269_v35, %v412_v52 }
  0xbf   :  { %v421_v1 = vshrl.u32 %v1735_v54, %v412_v52  ;;  %v352_v6 = vsel %vm350_vm13, %v351_v57, %v1445_v44  ;;  %v424_v10 = vshrl.u32 %v1264_v43, %v412_v52  ;;  %v426_v14 = vshll.u32 %v1264_v43, %v411_v45 }
  0xc0   :  { %v427_v15 = vshrl.u32 %v1265_v48, %v412_v52  ;;  %v353_v18 = vadd.s32 %v352_v6, %v348_v49  ;;  %v416_v21 = vor.u32 %v415_v62, %v414_v55  ;;  %v419_v27 = vor.u32 %v418_v0, %v417_v47 }
  0xc1   :  { %v422_v32 = vor.u32 %v421_v1, %v420_v25  ;;  %v425_v33 = vor.u32 %v424_v10, %v423_v59  ;;  %vm432_vm14 = vcmp.lt.s32.totalorder %v410_v28, 4  ;;  %v110_v37 = vor.u32 %v109_v29, %v108_v51 }
  0xc2   :  { %v428_v36 = vor.u32 %v427_v15, %v426_v14  ;;  %v354_v26 = vadd.s32 536870912, %v353_v18  ;;  %v433_v56 = vsel %vm429_vm10, %v413_v34, %v416_v21  ;;  %v437_v44 = vsel %vm429_vm10, %v416_v21, %v419_v27 }
  0xc3   :  { %v434_v38 = vsel %vm432_vm14, %v422_v32, 2102212464  ;;  %v438_v54 = vsel %vm432_vm14, %v425_v33, 920167782  ;;  %v441_v43 = vsel %vm429_vm10, %v419_v27, %v422_v32  ;;  %v107_v47 = vor.u32 %v106_v8, %v105_v24 }
  0xc4   :  { %v435_v57 = vsel %vm431_vm11, %v419_v27, %v434_v38  ;;  %v442_v45 = vsel %vm432_vm14, %v428_v36, 1326507024  ;;  %v1478_v49 = vshrl.u32 %v354_v26, 30  ;;  %v439_v52 = vsel %vm431_vm11, %v422_v32, %v438_v54 }
  0xc5   :  { %v443_v55 = vsel %vm431_vm11, %v425_v33, %v442_v45  ;;  %v440_v51 = vsel %vm430_vm12, %v437_v44, %v439_v52  ;;  %v101_v25 = vshrl.u32 %v1268_v20, %v1362_v40  ;;  %v436_v59 = vsel %vm430_vm12, %v433_v56, %v435_v57 }
  0xc6   :  { %v444_v29 = vsel %vm430_vm12, %v441_v43, %v443_v55  ;;  %v356_v38 = vshll.u32 %v1478_v49, 30  ;;  %v1494_v54 = vmul.u32.u64.low %v1448_v46, %v440_v51  ;;  %v1495_v24 = vmul.u32.u64.high %v1448_v46, %v440_v51, %v1494_v54 }
  0xc7   :  { %v1490_v26 = vmul.u32.u64.low %v1448_v46, %v444_v29  ;;  %v1491_v34 = vmul.u32.u64.high %v1448_v46, %v444_v29, %v1490_v26  ;;  %v122_v40 = vsel %vm120_vm3, %v110_v37, 2102212464  ;;  %v125_v56 = vsel %vm117_vm15, %v1426_v30, %v107_v47 }
  0xc8   :  { %v1501_v8 = vsub.s32 %v353_v18, %v356_v38  ;;  %v127_v28 = vsel %vm119_vm0, %v110_v37, %v1408_v16  ;;  %v121_v62 = vsel %vm117_vm15, %v101_v25, %v1426_v30  ;;  %v129_v1 = vsel %vm117_vm15, %v107_v47, %v110_v37 }
  0xc9   :  { %v128_v0 = vsel %vm118_vm2, %v125_v56, %v127_v28  ;;  %v131_v6 = vsel %vm119_vm0, %v1382_v58, %v1418_v22  ;;  %vm454_vm3 = vc.u32 %v1491_v34, %v1494_v54  ;;  %v123_v16 = vsel %vm119_vm0, %v107_v47, %v122_v40 }
  0xca   :  { %v359_v10 = vsub.s32 0, %v1501_v8  ;;  %v132_v14 = vsel %vm118_vm2, %v129_v1, %v131_v6  ;;  %v219_v30 = vshrl.u32 %v1265_v48, %v1391_v63  ;;  %v455_v15 = vadd.s32 1, %v1495_v24 }
  0xcb   :  { %v1527_v18 = vmul.u32.u64.low %v1384_v60, %v132_v14  ;;  %v1528_v21 = vmul.u32.u64.high %v1384_v60, %v132_v14, %v1527_v18  ;;  %v452_v22 = vmul.u32 %v1448_v46, %v436_v59  ;;  %v217_v33 = vor.u32 %v1422_v23, %v1403_v12 }
  0xcc   :  { %v985_v58 = vmin.u32 %v359_v10, %v1501_v8  ;;  %v1533_v27 = vmul.u32.u64.low %v1384_v60, %v128_v0  ;;  %v1534_v32 = vmul.u32.u64.high %v1384_v60, %v128_v0, %v1533_v27  ;;  %v456_v48 = vsel %vm454_vm3, %v455_v15, %v1495_v24 }
  0xcd   :  { %v124_v36 = vsel %vm118_vm2, %v121_v62, %v123_v16  ;;  %v207_v37 = vshrl.u32 %v1267_v9, %v1391_v63  ;;  %v457_v57 = vadd.s32 %v456_v48, %v452_v22  ;;  %v206_v46 = vshll.u32 %v1268_v20, %v1371_v50 }
  0xce   :  { %v361_v44 = vclz %v985_v58  ;;  %v210_v43 = vshrl.u32 %v1269_v35, %v1391_v63  ;;  %vm142_vm5 = vc.u32 %v1528_v21, %v1533_v27  ;;  %v209_v12 = vshll.u32 %v1267_v9, %v1371_v50 }
  0xcf   :  { %v1736_v23 = vmov 2102212464   ;;  %v220_v52 = vor.u32 %v219_v30, %v1412_v17  ;;  %v458_v47 = vadd.s32 536870912, %v457_v57  ;;  %v143_v51 = vadd.s32 1, %v1534_v32 }
  0xd0   :  { %v213_v45 = vshrl.u32 %v1736_v23, %v1391_v63  ;;  %v986_v55 = vadd.s32 4294967294, %v361_v44  ;;  %v140_v29 = vmul.u32 %v1384_v60, %v124_v36  ;;  %v208_v25 = vor.u32 %v207_v37, %v206_v46 }
  0xd1   :  { %v211_v38 = vor.u32 %v210_v43, %v209_v12  ;;  %v230_v9 = vsel %vm224_vm4, %v217_v33, 920167782  ;;  %v1561_v26 = vshrl.u32 %v458_v47, 30  ;;  %v144_v50 = vsel %vm142_vm5, %v143_v51, %v1534_v32 }
  0xd2   :  { %v214_v59 = vor.u32 %v213_v45, %v212_v53  ;;  %vm987_vm6 = vcmp.lt.s32.totalorder %v986_v55, 0  ;;  %v145_v35 = vadd.s32 %v144_v50, %v140_v29  ;;  %v197_v17 = vor.u32 8388608, %v1388_v61 }
  0xd3   :  { %v234_v24 = vsel %vm224_vm4, %v220_v52, 1326507024  ;;  %v460_v40 = vshll.u32 %v1561_v26, 30  ;;  %vm221_vm7 = vcmp.lt.s32.totalorder %v1399_v11, 1  ;;  %vm223_vm8 = vcmp.lt.s32.totalorder %v1399_v11, 3 }
  0xd4   :  { %v146_v60 = vadd.s32 536870912, %v145_v35  ;;  %v229_v56 = vsel %vm221_vm7, %v208_v25, %v211_v38  ;;  %v231_v28 = vsel %vm223_vm8, %v214_v59, %v230_v9  ;;  %v233_v62 = vsel %vm221_vm7, %v211_v38, %v214_v59 }
  0xd5   :  { %v364_v61 = vsel %vm987_vm6, 0, %v986_v55  ;;  %v461_v0 = vsub.s32 %v457_v57, %v460_v40  ;;  %vm222_vm9 = vcmp.lt.s32.totalorder %v1399_v11, 2  ;;  %v235_v6 = vsel %vm223_vm8, %v217_v33, %v234_v24 }
  0xd6   :  { %v1576_v1 = vshrl.u32 %v146_v60, 30  ;;  %v237_v10 = vshll.u32 %v197_v17, 8  ;;  %v226_v14 = vsel %vm224_vm4, %v214_v59, 2102212464  ;;  %v232_v30 = vsel %vm222_vm9, %v229_v56, %v231_v28 }
  0xd7   :  { %v463_v16 = vsub.s32 0, %v461_v0  ;;  %v236_v15 = vsel %vm222_vm9, %v233_v62, %v235_v6  ;;  %v369_v18 = vsub.s32 4294967266, %v364_v61  ;;  %v205_v33 = vshrl.u32 %v1268_v20, %v1391_v63 }
  0xd8   :  { %v148_v58 = vshll.u32 %v1576_v1, 30  ;;  %v1588_v22 = vmul.u32.u64.low %v237_v10, %v236_v15  ;;  %v1589_v32 = vmul.u32.u64.high %v237_v10, %v236_v15, %v1588_v22  ;;  %v227_v43 = vsel %vm223_vm8, %v211_v38, %v226_v14 }
  0xd9   :  { %v989_v48 = vmin.u32 %v463_v16, %v461_v0  ;;  %v1593_v37 = vmul.u32.u64.low %v237_v10, %v232_v30  ;;  %v1594_v44 = vmul.u32.u64.high %v237_v10, %v232_v30, %v1593_v37  ;;  %v225_v46 = vsel %vm221_vm7, %v205_v33, %v208_v25 }
  0xda   :  { %v149_v36 = vsub.s32 %v145_v35, %v148_v58  ;;  %v370_v12 = vadd.s32 127, %v369_v18  ;;  %v228_v52 = vsel %vm222_vm9, %v225_v46, %v227_v43  ;;  %v365_v20 = vsub.s32 32, %v364_v61 }
  0xdb   :  { %v465_v57 = vclz %v989_v48  ;;  %v247_v63 = vadd.s32 1, %v1594_v44  ;;  %vm246_vm11 = vc.u32 %v1589_v32, %v1593_v37  ;;  %v349_v29 = vadd.s32 %v1444_v42, %v1441_v39 }
  0xdc   :  { %v151_v53 = vsub.s32 0, %v149_v36  ;;  %v371_v55 = vshll.u32 %v370_v12, 23  ;;  %v244_v59 = vmul.u32 %v237_v10, %v228_v52  ;;  %v453_v35 = vadd.s32 %v1494_v54, %v1491_v34 }
  0xdd   :  { %v990_v23 = vadd.s32 4294967294, %v465_v57  ;;  %v248_v11 = vsel %vm246_vm11, %v247_v63, %v1594_v44  ;;  %v367_v50 = vshrl.u32 %v349_v29, %v365_v20  ;;  %v366_v40 = vshll.u32 %v1501_v8, %v364_v61 }
  0xde   :  { %v977_v45 = vmin.u32 %v151_v53, %v149_v36  ;;  %v249_v24 = vadd.s32 %v248_v11, %v244_v59  ;;  %v372_v60 = vor.u32 4788187, %v371_v55  ;;  %v141_v42 = vadd.s32 %v1533_v27, %v1528_v21 }
  0xdf   :  { %vm991_vm10 = vcmp.lt.s32.totalorder %v990_v23, 0  ;;  %v368_v16 = vor.u32 %v367_v50, %v366_v40  ;;  %v1270_v21 = vmov 2   ;;  %vm295_vm13 = vcmp.lt.s32.totalorder %v1352_v31, 0 }
  0xe0   :  { %v468_v47 = vsel %vm991_vm10, 0, %v990_v23  ;;  %v153_v51 = vclz %v977_v45  ;;  %v250_v39 = vadd.s32 536870912, %v249_v24  ;;  %v373_v18 = vand.u32 2147483647, %v372_v60  ;;  %1158 = vset.pattern.permute.xlu1 %v1270_v21  ;;  %1159 = vset.pattern.permute.xlu0 %v1270_v21 }
  0xe1   :  { %v469_v25 = vsub.s32 32, %v468_v47  ;;  %v473_v38 = vsub.s32 4294967266, %v468_v47  ;;  %v470_v14 = vshll.u32 %v461_v0, %v468_v47  ;;  %v375_v48 = vcvt.s32.f32 %v368_v16  ;;  %506 = vperm.xlu1 %1158, %v1314_v2   ;;  %510 = vperm.xlu0 %1159, %v1321_v3  }
  0xe2   :  { %v978_v9 = vadd.s32 4294967294, %v153_v51  ;;  %v1614_v15 = vshrl.u32 %v250_v39, 30  ;;  %v1737_v29 = vand.u32 2147483647, %v1352_v31  ;;  %vm399_vm0 = vcmp.lt.s32.totalorder %v1364_v41, 0 }
  0xe3   :  { %v474_v17 = vadd.s32 127, %v473_v38  ;;  %v471_v56 = vshrl.u32 %v453_v35, %v469_v25  ;;  %v376_v0 = vmul.f32 %v375_v48, %v373_v18  ;;  %vm87_vm4 = vcmp.lt.s32.totalorder %v1345_v13, 0 }
  0xe4   :  { %vm979_vm12 = vcmp.lt.s32.totalorder %v978_v9, 0  ;;  %v252_v58 = vshll.u32 %v1614_v15, 30  ;;  %vm1626_vm15 = vcmp.le.f32.partialorder %v1737_v29, 0.7853982  ;;  %v483_v16 = vsub.s32 4, %v1561_v26 }
  0xe5   :  { %v475_v28 = vshll.u32 %v474_v17, 23  ;;  %v156_v62 = vsel %vm979_vm12, 0, %v978_v9  ;;  %v472_v8 = vor.u32 %v471_v56, %v470_v14  ;;  %514 = vperm.xlu1 %1158, %v1328_v4   ;;  %v377_v45 = vxor.u32 2147483648, %v376_v0 }
  0xe6   :  { %v157_v6 = vsub.s32 32, %v156_v62  ;;  %v161_v10 = vsub.s32 4294967266, %v156_v62  ;;  %v158_v61 = vshll.u32 %v149_v36, %v156_v62  ;;  %v253_v57 = vsub.s32 %v249_v24, %v252_v58 }
  0xe7   :  { %v476_v30 = vor.u32 4788187, %v475_v28  ;;  %v479_v46 = vcvt.s32.f32 %v472_v8  ;;  %v378_v47 = vsel %vm295_vm13, %v377_v45, %v376_v0  ;;  %v245_v9 = vadd.s32 %v1593_v37, %v1589_v32 }
  0xe8   :  { %v159_v34 = vshrl.u32 %v141_v42, %v157_v6  ;;  %v162_v54 = vadd.s32 127, %v161_v10  ;;  %v255_v43 = vsub.s32 0, %v253_v57  ;;  %v381_v35 = vsel %vm1626_vm15, %v1352_v31, %v378_v47 }
  0xe9   :  { %v477_v33 = vand.u32 2147483647, %v476_v30  ;;  %518 = vperm.xlu1 %1158, %v1333_v5   ;;  %v1740_v17 = vand.u32 2147483647, %v1364_v41  ;;  %v1743_v28 = vand.u32 2147483647, %v1345_v13  ;;  %1167 = vcosq.f32 %v381_v35 }
  0xea   :  { %v163_v22 = vshll.u32 %v162_v54, 23  ;;  %v160_v44 = vor.u32 %v159_v34, %v158_v61  ;;  %v981_v23 = vmin.u32 %v255_v43, %v253_v57  ;;  %v379_v6 = vsub.s32 4, %v1478_v49 }
  0xeb   :  { %v480_v36 = vmul.f32 %v479_v46, %v477_v33  ;;  %vm1640_vm2 = vcmp.le.f32.partialorder %v1740_v17, 0.7853982  ;;  %vm1652_vm3 = vcmp.le.f32.partialorder %v1743_v28, 0.7853982  ;;  %1169 = vsinq.f32 %v381_v35 }
  0xec   :  { %v164_v27 = vor.u32 4788187, %v163_v22  ;;  %v167_v53 = vcvt.s32.f32 %v160_v44  ;;  %v257_v63 = vclz %v981_v23  ;;  %v171_v30 = vsub.s32 4, %v1576_v1 }
  0xed   :  { %v481_v20 = vxor.u32 2147483648, %v480_v36  ;;  %v380_v18 = vsel %vm295_vm13, %v379_v6, %v1478_v49  ;;  %v275_v8 = vsub.s32 4, %v1614_v15  ;;  %v484_v61 = vsel %vm399_vm0, %v483_v16, %v1561_v26 }
  0xee   :  { %v165_v12 = vand.u32 2147483647, %v164_v27  ;;  %v982_v55 = vadd.s32 4294967294, %v257_v63  ;;  %v172_v22 = vsel %vm87_vm4, %v171_v30, %v1576_v1  ;;  %v382_v48 = vsel %vm1626_vm15, 0, %v380_v18 }
  0xef   :  { %v482_v59 = vsel %vm399_vm0, %v481_v20, %v480_v36  ;;  %vm191_vm5 = vcmp.lt.s32.totalorder %v1348_v19, 0  ;;  %v486_v49 = vsel %vm1640_vm2, 0, %v484_v61  ;;  %v174_v26 = vsel %vm1652_vm3, 0, %v172_v22 }
  0xf0   :  { %v168_v52 = vmul.f32 %v167_v53, %v165_v12  ;;  %vm983_vm14 = vcmp.lt.s32.totalorder %v982_v55, 0  ;;  %v485_v37 = vsel %vm1640_vm2, %v1364_v41, %v482_v59  ;;  %v276_v44 = vsel %vm191_vm5, %v275_v8, %v1614_v15  ;;  %v503_v8 = vld [vmem:[#allocation2 + $0x10] sm:$0xff] }
  0xf1   :  { %v260_v38 = vsel %vm983_vm14, 0, %v982_v55  ;;  %1171 = vcosq.f32 %v485_v37  ;;  %v1746_v21 = vand.u32 2147483647, %v1348_v19  ;;  %v386_v1 = vadd.s32 3, %v382_v48 }
  0xf2   :  { %v169_v51 = vxor.u32 2147483648, %v168_v52  ;;  %v261_v11 = vsub.s32 32, %v260_v38  ;;  %v265_v50 = vsub.s32 4294967266, %v260_v38  ;;  %v262_v60 = vshll.u32 %v253_v57, %v260_v38 }
  0xf3   :  { %1173 = vsinq.f32 %v485_v37  ;;  %v1168_v57 = vpop.eup %1167  ;;  %vm190_vm6 = vcmp.le.f32.partialorder %v1746_v21, 0.7853982  ;;  %v490_v43 = vadd.s32 3, %v486_v49  ;;  %v178_v23 = vadd.s32 3, %v174_v26 }
  0xf4   :  { %v170_v40 = vsel %vm87_vm4, %v169_v51, %v168_v52  ;;  %v263_v56 = vshrl.u32 %v245_v9, %v261_v11  ;;  %v266_v32 = vadd.s32 127, %v265_v50  ;;  %v278_v36 = vsel %vm190_vm6, 0, %v276_v44 }
  0xf5   :  { %v173_v10 = vsel %vm1652_vm3, %v1345_v13, %v170_v40  ;;  %v1170_v0 = vpop.eup %1169  ;;  %v387_v45 = vand.u32 3, %v386_v1  ;;  %v282_v63 = vadd.s32 3, %v278_v36  ;;  %v491_v20 = vand.u32 3, %v490_v43 }
  0xf6   :  { %v264_v39 = vor.u32 %v263_v56, %v262_v60  ;;  %v267_v42 = vshll.u32 %v266_v32, 23  ;;  %1175 = vcosq.f32 %v173_v10  ;;  %v390_v55 = vxor.u32 2147483648, %v1170_v0 }
  0xf7   :  { %1177 = vsinq.f32 %v173_v10  ;;  %v393_v47 = vxor.u32 2147483648, %v1168_v57  ;;  %v179_v25 = vand.u32 3, %v178_v23  ;;  %vm389_vm7 = vcmp.eq.s32.totalorder %v387_v45, 0  ;;  %v625_v23 = vld [vmem:[#allocation2 + $0x28] sm:$0xff] }
  0xf8   :  { %v268_v14 = vor.u32 4788187, %v267_v42  ;;  %v271_v54 = vcvt.s32.f32 %v264_v39  ;;  %v283_v9 = vand.u32 3, %v282_v63  ;;  %vm392_vm8 = vcmp.eq.s32.totalorder %v387_v45, 2 }
  0xf9   :  { %vm493_vm9 = vcmp.eq.s32.totalorder %v491_v20, 0  ;;  %vm496_vm10 = vcmp.eq.s32.totalorder %v491_v20, 2  ;;  %v391_v11 = vsel %vm389_vm7, %v1168_v57, %v390_v55  ;;  %v394_v50 = vsel %vm392_vm8, %v393_v47, %v1170_v0 }
  0xfa   :  { %v269_v34 = vand.u32 2147483647, %v268_v14  ;;  %vm181_vm11 = vcmp.eq.s32.totalorder %v179_v25, 0  ;;  %vm184_vm12 = vcmp.eq.s32.totalorder %v179_v25, 2  ;;  %vm388_vm13 = vcmp.lt.s32.totalorder %v387_v45, 2  ;;  %v627_v45 = vld [vmem:[#allocation2 + $0x38] sm:$0xff] }
  0xfb   :  { %v1172_v12 = vpop.eup %1171  ;;  %vm492_vm14 = vcmp.lt.s32.totalorder %v491_v20, 2  ;;  %v395_v37 = vsel %vm388_vm13, %v391_v11, %v394_v50  ;;  %vm180_vm15 = vcmp.lt.s32.totalorder %v179_v25, 2  ;;  %vm288_vm0 = vcmp.eq.s32.totalorder %v283_v9, 2 }
  0xfc   :  { %v272_v58 = vmul.f32 %v271_v54, %v269_v34  ;;  %v497_v29 = vxor.u32 2147483648, %v1172_v12  ;;  %vm385_vm2 = vweird.f32 %v1352_v31  ;;  %vm285_vm4 = vcmp.eq.s32.totalorder %v283_v9, 0  ;;  %v502_v31 = vld [vmem:[#allocation2 + $0x8] sm:$0xff] }
  0xfd   :  { %v1174_v53 = vpop.eup %1173  ;;  %vm489_vm3 = vweird.f32 %v1364_v41  ;;  %v396_v10 = vsel %vm385_vm2, nan, %v395_v37  ;;  %vm281_vm7 = vweird.f32 %v1348_v19  ;;  %v504_v41 = vld [vmem:[#allocation2 + $0x18] sm:$0xff]  ;;  %v1272_v63 = vmov 4  }
  0xfe   :  { %v273_v33 = vxor.u32 2147483648, %v272_v58  ;;  %v494_v51 = vxor.u32 2147483648, %v1174_v53  ;;  %v498_v17 = vsel %vm496_vm10, %v497_v29, %v1174_v53  ;;  %vm1274_vm8 = vmmov 0  }
  0xff   :  { %v1275_v37 = vmov 0.0  }
 0x100   :  { %v274_v27 = vsel %vm191_vm5, %v273_v33, %v272_v58  ;;  %v1176_v15 = vpop.eup %1175  ;;  %v495_v35 = vsel %vm493_vm9, %v1172_v12, %v494_v51  ;;  %vm284_vm5 = vcmp.lt.s32.totalorder %v283_v9, 2 }
 0x101   :  { %v277_v46 = vsel %vm190_vm6, %v1348_v19, %v274_v27  ;;  %v1178_v52 = vpop.eup %1177  ;;  %v185_v59 = vxor.u32 2147483648, %v1176_v15  ;;  %v499_v28 = vsel %vm492_vm14, %v495_v35, %v498_v17  ;;  %vm177_vm6 = vweird.f32 %v1345_v13  ;;  %v624_v13 = vld [vmem:[#allocation2 + $0x20] sm:$0xff] }
 0x102   :  { %1179 = vcosq.f32 %v277_v46  ;;  %v182_v38 = vxor.u32 2147483648, %v1178_v52  ;;  %v500_v16 = vsel %vm489_vm3, nan, %v499_v28  ;;  %1056 = vmatprep.mubr.msk.f32.mxu1 %vm521_vm1, %v624_v13  ;;  %v1271_v19 = vmov 3   ;;  %v34_v28 = vld [vmem:[%s1729_s2] sm:$0x3] }
 0x103   :  { %1181 = vsinq.f32 %v277_v46  ;;  %v186_v60 = vsel %vm184_vm12, %v185_v59, %v1178_v52  ;;  %v1091_v18 = vpack.c.bf16 %v500_v16, %v396_v10  ;;  %1161 = vset.pattern.permute.xlu1 %v1271_v19  ;;  %1160 = vset.pattern.permute.xlu0 %v1271_v19  ;;  %v746_v52 = vld [vmem:[#allocation2 + $0x40] sm:$0xff] }
 0x104   :  { %v183_v40 = vsel %vm181_vm11, %v1176_v15, %v182_v38  ;;  %633 = vperm.xlu1 %1161, %v1321_v3   ;;  %629 = vperm.xlu0 %1160, %v1314_v2   ;;  %v626_v15 = vld [vmem:[#allocation2 + $0x30] sm:$0xff] }
 0x105   :  { %v187_v39 = vsel %vm180_vm15, %v183_v40, %v186_v60  ;;  %v747_v40 = vld [vmem:[#allocation2 + $0x48] sm:$0xff]  ;;  %v748_v60 = vld [vmem:[#allocation2 + $0x50] sm:$0xff] }
 0x106   :  { %v188_v30 = vsel %vm177_vm6, nan, %v187_v39  ;;  %v1277_v39 = vmov 6  }
 0x108   :  { %637 = vperm.xlu1 %1161, %v1328_v4   ;;  %641 = vperm.xlu0 %1160, %v1333_v5  }
 0x10c   :  { %v1180_v24 = vpop.eup %1179  ;;  %1162 = vset.pattern.permute.xlu1 %v1272_v63  ;;  %1163 = vset.pattern.permute.xlu0 %v1272_v63 }
 0x10d   :  { %v1182_v56 = vpop.eup %1181  ;;  %v289_v32 = vxor.u32 2147483648, %v1180_v24  ;;  %751 = vperm.xlu1 %1162, %v1314_v2   ;;  %755 = vperm.xlu0 %1163, %v1321_v3  }
 0x10e   :  { %v286_v62 = vxor.u32 2147483648, %v1182_v56 }
 0x10f   :  { %v290_v42 = vsel %vm288_vm0, %v289_v32, %v1182_v56  ;;  %v749_v56 = vld [vmem:[#allocation2 + $0x58] sm:$0xff]  ;;  %v1273_v32 = vmov 0.0|0.0  }
 0x110   :  { %v287_v6 = vsel %vm285_vm4, %v1180_v24, %v286_v62  ;;  %v1276_v62 = vmov 5  }
 0x111   :  { %v291_v14 = vsel %vm284_vm5, %v287_v6, %v290_v42  ;;  %759 = vperm.xlu1 %1162, %v1328_v4   ;;  %1164 = vset.pattern.permute.xlu0 %v1276_v62 }
 0x112   :  { %v292_v34 = vsel %vm281_vm7, nan, %v291_v14  ;;  %871 = vperm.xlu0 %1164, %v34_v28  }
 0x113   :  { %v1087_v54 = vpack.c.bf16 %v292_v34, %v188_v30 }
 0x115   :  { %1088 = vmatprep.subr.bf16.mxu0 %v1087_v54  ;;  %763 = vperm.xlu1 %1162, %v1333_v5  }
 0x116   :  { %1090 = vmatpush3.bf16.msra.mxu0 %v1087_v54  ;;  %1166 = vset.pattern.permute.xlu0 %v1277_v39 }
 0x117   :  { %1092 = vmatprep.subr.bf16.mxu0 %v1091_v18 }
 0x119   :  { %1165 = vset.pattern.permute.xlu1 %v1277_v39 }
 0x11a   :  { %1094 = vmatpush3.bf16.msra.mxu0 %v1091_v18  ;;  %956 = vperm.xlu1 %1165, %v34_v28  }
 0x11d   :  { %1043 = vmatmul.mubr.msk.f32.vlgmr.msra.gmra.mrb[0].mxu0 %vm521_vm1, %v502_v31 }
 0x11e   :  { %1045 = vmatprep.mubr.msk.f32.mxu0 %vm521_vm1, %v503_v8 }
 0x121   :  { %1046 = vmatmul.mubr.msk.f32.gmra.mrb[2].mxu0 %vm521_vm1, %v504_v41 }
 0x122   :  { %1070 = vmatprep.mubr.msk.f32.mxu0 %vm521_vm1, %v746_v52 }
 0x160   :  { %v507_v61 = vpop.permute.xlu1 %506  ;;  %v511_v22 = vpop.permute.xlu0 %510 }
 0x164   :  { %v515_v58 = vpop.permute.xlu1 %514 }
 0x168   :  { %v519_v57 = vpop.permute.xlu1 %518 }
 0x183   :  { %v630_v20 = vpop.permute.xlu0 %629  ;;  %v634_v55 = vpop.permute.xlu1 %633 }
 0x187   :  { %v642_v38 = vpop.permute.xlu0 %641  ;;  %v638_v9 = vpop.permute.xlu1 %637 }
 0x18c   :  { %v752_v42 = vpop.permute.xlu1 %751  ;;  %v756_v10 = vpop.permute.xlu0 %755 }
 0x190   :  { %v760_v6 = vpop.permute.xlu1 %759 }
 0x194   :  { %v764_v54 = vpop.permute.xlu1 %763 }
 0x1f0   :  { %v1044_v48 = vpop.f32.mrb[0].mxu0 }
 0x1f1   :  { %v606_v33 = vadd.f32 %v1044_v48, %v511_v22  ;;  %v600_v49 = vpop.f32.mrb[1].mxu0 }
 0x1f2   :  { %v601_v44 = vadd.f32 %v600_v49, %v507_v61  ;;  %v1209_v49 = vld [vmem:[%s1727_s0] sm:$0x1] }
 0x1f3   :  { %1183 = vtanh.f32 %v606_v33  ;;  %v868_v33 = vld [vmem:[#allocation2 + $0x60] sm:$0xff] }
 0x1f4   :  { %1185 = vtanh.f32 %v601_v44  ;;  %v1047_v26 = vpop.f32.mrb[2].mxu0 }
 0x1f5   :  { %v616_v21 = vadd.f32 %v1047_v26, %v519_v57  ;;  %v610_v27 = vpop.f32.mrb[3].mxu0  ;;  %v872_v57 = vpop.permute.xlu0 %871  ;;  %v1747_v26 = vsub.s32 0, %v1339_v7 }
 0x1f6   :  { %v611_v1 = vadd.f32 %v610_v27, %v515_v58 }
 0x1f7   :  { %1187 = vtanh.f32 %v616_v21 }
 0x1f8   :  { %1189 = vtanh.f32 %v611_v1 }
 0x1fd   :  { %v1184_v0 = vpop.eup %1183 }
 0x1fe   :  { %v1186_v46 = vpop.eup %1185 }
 0x1ff   :  { %v1095_v43 = vpack.c.bf16 %v1184_v0, %v1186_v46  ;;  %v957_v46 = vpop.permute.xlu1 %956 }
 0x201   :  { %v1188_v12 = vpop.eup %1187  ;;  %1096 = vmatprep.subr.bf16.mxu1 %v1095_v43 }
 0x202   :  { %v1190_v36 = vpop.eup %1189  ;;  %1098 = vmatpush3.bf16.msra.mxu1 %v1095_v43 }
 0x203   :  { %v1099_v53 = vpack.c.bf16 %v1188_v12, %v1190_v36 }
 0x205   :  { %1100 = vmatprep.subr.bf16.mxu1 %v1099_v53 }
 0x206   :  { %1102 = vmatpush3.bf16.msra.mxu1 %v1099_v53 }
 0x207   :  { %1111 = vmatprep.subr.bf16.mxu1 %v1273_v32 }
 0x209   :  { %1057 = vmatmul.mubr.msk.f32.vlgmr.msra.gmra.mrb[0].mxu1 %vm521_vm1, %v625_v23 }
 0x20a   :  { %1059 = vmatprep.mubr.msk.f32.mxu1 %vm521_vm1, %v626_v15 }
 0x20d   :  { %1060 = vmatmul.mubr.msk.f32.gmra.mrb[2].mxu1 %vm521_vm1, %v627_v45 }
 0x20e   :  { %1084 = vmatprep.mubr.msk.f32.mxu1 %vm1274_vm8, %v1275_v37 }
 0x2dc   :  { %v1058_v47 = vpop.f32.mrb[0].mxu1 }
 0x2dd   :  { %v728_v51 = vadd.f32 %v1058_v47, %v634_v55  ;;  %v722_v29 = vpop.f32.mrb[1].mxu1 }
 0x2de   :  { %v723_v25 = vadd.f32 %v722_v29, %v630_v20 }
 0x2df   :  { %1191 = vtanh.f32 %v728_v51 }
 0x2e0   :  { %1193 = vtanh.f32 %v723_v25  ;;  %v1061_v59 = vpop.f32.mrb[2].mxu1 }
 0x2e1   :  { %v738_v11 = vadd.f32 %v1061_v59, %v642_v38  ;;  %v732_v50 = vpop.f32.mrb[3].mxu1 }
 0x2e2   :  { %v733_v2 = vadd.f32 %v732_v50, %v638_v9 }
 0x2e3   :  { %1195 = vtanh.f32 %v738_v11 }
 0x2e4   :  { %1197 = vtanh.f32 %v733_v2 }
 0x2e9   :  { %v1192_v3 = vpop.eup %1191 }
 0x2ea   :  { %v1194_v4 = vpop.eup %1193 }
 0x2eb   :  { %v1103_v35 = vpack.c.bf16 %v1192_v3, %v1194_v4 }
 0x2ed   :  { %v1196_v5 = vpop.eup %1195  ;;  %1104 = vmatprep.subr.bf16.mxu0 %v1103_v35 }
 0x2ee   :  { %v1198_v17 = vpop.eup %1197  ;;  %1106 = vmatpush3.bf16.msra.mxu0 %v1103_v35 }
 0x2ef   :  { %v1107_v24 = vpack.c.bf16 %v1196_v5, %v1198_v17 }
 0x2f1   :  { %1108 = vmatprep.subr.bf16.mxu0 %v1107_v24 }
 0x2f2   :  { %1110 = vmatpush3.bf16.msra.mxu0 %v1107_v24 }
 0x2f5   :  { %1071 = vmatmul.mubr.msk.f32.vlgmr.msra.gmra.mrb[4].mxu0 %vm521_vm1, %v747_v40 }
 0x2f6   :  { %1073 = vmatprep.mubr.msk.f32.mxu0 %vm521_vm1, %v748_v60 }
 0x2f9   :  { %1074 = vmatmul.mubr.msk.f32.gmra.mrb[6].mxu0 %vm521_vm1, %v749_v56 }
 0x3c8   :  { %v1072_v16 = vpop.f32.mrb[4].mxu0 }
 0x3c9   :  { %v850_v14 = vadd.f32 %v1072_v16, %v756_v10  ;;  %v844_v30 = vpop.f32.mrb[5].mxu0 }
 0x3ca   :  { %v845_v34 = vadd.f32 %v844_v30, %v752_v42 }
 0x3cb   :  { %1199 = vtanh.f32 %v850_v14 }
 0x3cc   :  { %1201 = vtanh.f32 %v845_v34  ;;  %v1075_v18 = vpop.f32.mrb[6].mxu0 }
 0x3cd   :  { %v860_v31 = vadd.f32 %v1075_v18, %v764_v54  ;;  %v854_v8 = vpop.f32.mrb[7].mxu0 }
 0x3ce   :  { %v855_v41 = vadd.f32 %v854_v8, %v760_v6 }
 0x3cf   :  { %1203 = vtanh.f32 %v860_v31 }
 0x3d0   :  { %1205 = vtanh.f32 %v855_v41 }
 0x3d1   :  { %1207 = vtanh.f32 %v1209_v49 }
 0x3d5   :  { %v1200_v13 = vpop.eup %1199 }
 0x3d6   :  { %v1202_v19 = vpop.eup %1201 }
 0x3d7   :  { %v1112_v61 = vpack.c.bf16 %v1200_v13, %v1202_v19 }
 0x3d9   :  { %v1204_v58 = vpop.eup %1203  ;;  %1113 = vmatpush3.bf16.msra.mxu1 %v1112_v61 }
 0x3da   :  { %v1206_v22 = vpop.eup %1205  ;;  %1114 = vmatprep.subr.bf16.mxu1 %v1273_v32 }
 0x3db   :  { %v1115_v48 = vpack.c.bf16 %v1204_v58, %v1206_v22  ;;  %v1208_v44 = vpop.eup %1207 }
 0x3dc   :  { %v952_v21 = vrot.slane %v1208_v44, %v1747_v26 }
 0x3dd   :  { %1116 = vmatpush3.bf16.msra.mxu1 %v1115_v48 }
 0x3e0   :  { %1085 = vmatmul.mubr.msk.f32.vlgmr.msra.gmra.mrb[4].mxu1 %vm521_vm1, %v868_v33 }
 0x4b3   :  { %v943_v27 = vpop.f32.mrb[4].mxu1 }
 0x4b4   :  { %v944_v1 = vadd.f32 %v943_v27, %v872_v57  ;;  %v1086_v0 = vpop.f32.mrb[5].mxu1 }
 0x4b6   :  { %v954_v43 = vmul.f32 %v952_v21, %v944_v1 }
 0x4b8   :  { %v959_v12 = vadd.f32 %v957_v46, %v954_v43 }
 0x4ba   :  { %960 = vst [vmem:[#allocation5] sm:$0x3] %v959_v12 }
 0x4bb   :  { %1244 = shalt.err (!%p1241_p12)
}
 0x4bc   :  { %s1245_s15 = scalar_lea.hbm %s1730_s3, 32 }
 0x4bd   :  { %p1246_p13 = scmp.ne.s32.totalorder %s1730_s3, %s1245_s15  ;;  %p1249_p0 = scmp.lt.u32.totalorder %s1245_s15, %s1730_s3 }
 0x4bf   :  { %p1251_p1 = pnand %p1249_p0, %p1246_p13 }
 0x4c1   :  { %1254 = shalt.err (!%p1251_p1)
}
 0x4c2   :  { %970 = dma.vmem_to_hbm [thread:$0]  %s968_s12, 32, %s1730_s3, [#allocation4]  }
 0x4c3   :  { %1257 = dma.done.wait [#allocation4], 32  }
 0x4c4   :  { %1258 = vsyncadd [#allocation4], 4294967264 }
 0x4c5   :  { %974 = vsyncpa [#allocation3], 1 }
 0x4c6   :  { %975 = vsyncpa [#allocation4], 1 }

</bundles_post_ra>
